<compile_context>
chip_gen: v7x
topology: tpu7x:2x2x1
jax: 0.10.0
libtpu: 0.0.40
codegen_flags: <defaults>
</compile_context>

<pallas_src>
import jax
import jax.numpy as jnp
from jax.experimental import pallas as pl
from jax.experimental.pallas import tpu as pltpu


def _round_up(x, m):
    return ((x + m - 1) // m) * m


def gnn_kernel(x_ref, w1_ref, b1_ref, w2_ref, b2_ref, o_ref):
    # fc1 + ReLU (f32 accumulation regardless of MXU operand dtype).
    h = jnp.dot(x_ref[...], w1_ref[...], preferred_element_type=jnp.float32)
    h = jnp.maximum(h + b1_ref[...], 0.0)

    # fc2 (activation cast to the weights' MXU dtype; no-op for f32).
    logits = (
        jnp.dot(h.astype(w2_ref.dtype), w2_ref[...], preferred_element_type=jnp.float32)
        + b2_ref[...]
    )

    # Numerically stable log_softmax along the (unpadded) class axis.
    m = jnp.max(logits, axis=1, keepdims=True)
    s = logits - m
    lse = jnp.log(jnp.sum(jnp.exp(s), axis=1, keepdims=True))
    o_ref[...] = (s - lse).astype(o_ref.dtype)


def gnn_classifier(x, w1, b1, w2, b2, *, block_rows=8192, mxu_dtype=jnp.float32):
    """x: [N, input_dim]; w1: [input_dim, hidden]; b1: [hidden];
    w2: [hidden, output_dim]; b2: [output_dim] -> [N, output_dim] (f32)."""
    n, d = x.shape
    h_dim = w1.shape[1]
    c = w2.shape[1]

    in_bytes = jnp.dtype(mxu_dtype).itemsize
    # bf16 packs two rows per sublane -> minimum (16, lane) tile on the row axis.
    row_align = 16 if in_bytes < 4 else 8

    # Big row tile (per-step overhead dominates otherwise), sublane-aligned.
    tn = min(_round_up(block_rows, row_align), _round_up(n, row_align))
    # v7x megacore: prefer >= 2 parallel grid steps when the row count allows it.
    if _round_up(n, tn) // tn == 1 and tn >= 2 * row_align and n > row_align:
        tn = _round_up((tn + 1) // 2, row_align)
    n_p = _round_up(n, tn)

    # Only the row count is padded (no-op copy when n % tn == 0); feature,
    # hidden and class dims stay unpadded (full-extent last dims are legal).
    x_p = jnp.pad(x, ((0, n_p - n), (0, 0))).astype(mxu_dtype)
    w1_p = w1.astype(mxu_dtype)
    b1_p = b1.reshape(1, h_dim).astype(jnp.float32)
    w2_p = w2.astype(mxu_dtype)
    b2_p = b2.reshape(1, c).astype(jnp.float32)

    grid = (n_p // tn,)

    # Rough double-buffered VMEM footprint; only override the scoped-VMEM
    # default when a huge row tile actually needs it.
    est = (
        2 * (tn * d * in_bytes + tn * c * 4)              # x / out tiles, double-buffered
        + 2 * (d * h_dim + h_dim * c) * in_bytes          # weights (constant index_map)
        + 2 * (h_dim + c) * 4                             # biases
    )
    vmem_limit = int(min(2 * est, 48 * 1024 * 1024)) if est > 12 * 1024 * 1024 else None

    out = pl.pallas_call(
        gnn_kernel,
        out_shape=jax.ShapeDtypeStruct((n_p, c), jnp.float32),
        grid_spec=pl.GridSpec(
            grid=grid,
            in_specs=[
                # x: pipelined over row tiles, unpadded feature dim.
                pl.BlockSpec((tn, d), lambda i: (i, 0)),
                # Weights / biases: same block every step -> VMEM-resident, DMA'd once.
                pl.BlockSpec((d, h_dim), lambda i: (0, 0)),
                pl.BlockSpec((1, h_dim), lambda i: (0, 0)),
                pl.BlockSpec((h_dim, c), lambda i: (0, 0)),
                pl.BlockSpec((1, c), lambda i: (0, 0)),
            ],
            out_specs=pl.BlockSpec((tn, c), lambda i: (i, 0)),
        ),
        compiler_params=pltpu.CompilerParams(
            # Independent row tiles -> shardable across v7x's two TensorCores.
            dimension_semantics=("parallel",),
            vmem_limit_bytes=vmem_limit,
        ),
    )(x_p, w1_p, b1_p, w2_p, b2_p)

    # Strip row padding only (class dim is already exact).
    return out[:n, :]


def reference(x, w1, b1, w2, b2):
    h = jnp.maximum(x @ w1 + b1, 0.0)
    logits = h @ w2 + b2
    return jax.nn.log_softmax(logits, axis=1)


if __name__ == "__main__":
    # Deterministic synthetic parameters (shapes from GNNClassifier.__init__).
    input_dim, hidden_dim, output_dim = 16, 32, 8
    batch = 8

    key = jax.random.PRNGKey(0)
    kx, k1, kb1, k2, kb2 = jax.random.split(key, 5)

    x = jax.random.normal(kx, (batch, input_dim), dtype=jnp.float32)
    # nn.Linear stores weight as [out, in]; we keep [in, out] so the kernel computes x @ W + b.
    w1 = jax.random.normal(k1, (input_dim, hidden_dim), dtype=jnp.float32) * 0.1
    b1 = jax.random.normal(kb1, (hidden_dim,), dtype=jnp.float32) * 0.1
    w2 = jax.random.normal(k2, (hidden_dim, output_dim), dtype=jnp.float32) * 0.1
    b2 = jax.random.normal(kb2, (output_dim,), dtype=jnp.float32) * 0.1

    # f32 MXU path: tight tolerance vs. the pure-JAX reference.
    out = gnn_classifier(x, w1, b1, w2, b2)
    jax.block_until_ready(out)
    ref = reference(x, w1, b1, w2, b2)
    assert out.shape == (batch, output_dim)
    assert jnp.allclose(out, ref, atol=1e-5, rtol=1e-5)

    # Ragged row count: exercises row padding + a 2-step parallel grid.
    n2 = 40
    x2 = jax.random.normal(jax.random.PRNGKey(1), (n2, input_dim), dtype=jnp.float32)
    out2 = gnn_classifier(x2, w1, b1, w2, b2)
    jax.block_until_ready(out2)
    assert jnp.allclose(out2, reference(x2, w1, b1, w2, b2), atol=1e-5, rtol=1e-5)

    # bf16 MXU operands (recommended default at scale on v6e/v7x; also fine on
    # v5e) with f32 accumulation — relaxed tolerance by construction.
    out_bf16 = gnn_classifier(x, w1, b1, w2, b2, mxu_dtype=jnp.bfloat16)
    jax.block_until_ready(out_bf16)
    assert jnp.allclose(out_bf16, ref, atol=2e-2, rtol=2e-2)

    print("KERNEL_OK")
</pallas_src>

<mosaic_0001>
module attributes {stable_mosaic.version = 11 : i64} {
  func.func @gnn_kernel(%arg0: i32, %arg1: memref<8x16xf32, #tpu.memory_space<vmem>>, %arg2: memref<16x32xf32, #tpu.memory_space<vmem>>, %arg3: memref<1x32xf32, #tpu.memory_space<vmem>>, %arg4: memref<32x8xf32, #tpu.memory_space<vmem>>, %arg5: memref<1x8xf32, #tpu.memory_space<vmem>>, %arg6: memref<8x8xf32, #tpu.memory_space<vmem>>) attributes {dimension_semantics = [#tpu.dimension_semantics<parallel>], iteration_bounds = array<i64: 1>, scalar_prefetch = 0 : i64, scratch_operands = 0 : i64, tpu.core_type = #tpu.core_type<tc>, window_params = [{transform_indices = @transform_0, window_bounds = array<i64: 8, 16>}, {pipeline_mode = #tpu.pipeline_mode<synchronous>, transform_indices = @transform_1, window_bounds = array<i64: 16, 32>}, {pipeline_mode = #tpu.pipeline_mode<synchronous>, transform_indices = @transform_2, window_bounds = array<i64: 1, 32>}, {pipeline_mode = #tpu.pipeline_mode<synchronous>, transform_indices = @transform_3, window_bounds = array<i64: 32, 8>}, {pipeline_mode = #tpu.pipeline_mode<synchronous>, transform_indices = @transform_4, window_bounds = array<i64: 1, 8>}, {transform_indices = @transform_5, window_bounds = array<i64: 8, 8>}]} {
    %c0 = arith.constant 0 : index
    %c0_0 = arith.constant 0 : index
    %0 = vector.load %arg1[%c0, %c0_0] : memref<8x16xf32, #tpu.memory_space<vmem>>, vector<8x16xf32>
    %c0_1 = arith.constant 0 : index
    %c0_2 = arith.constant 0 : index
    %1 = vector.load %arg2[%c0_1, %c0_2] : memref<16x32xf32, #tpu.memory_space<vmem>>, vector<16x32xf32>
    %cst = arith.constant dense<0.000000e+00> : vector<8x32xf32>
    %2 = tpu.matmul %0, %1, %cst {dimension_numbers = #tpu.dot_dimension_numbers<[1], [0], [0], [1], [0, 0, 1, 1], [], []>} : vector<8x16xf32>, vector<16x32xf32>, vector<8x32xf32> -> vector<8x32xf32>
    %c0_3 = arith.constant 0 : index
    %c0_4 = arith.constant 0 : index
    %3 = vector.load %arg3[%c0_3, %c0_4] : memref<1x32xf32, #tpu.memory_space<vmem>>, vector<1x32xf32>
    %4 = vector.broadcast %3 : vector<1x32xf32> to vector<8x32xf32>
    %5 = arith.addf %2, %4 : vector<8x32xf32>
    %cst_5 = arith.constant 0.000000e+00 : f32
    %6 = vector.broadcast %cst_5 : f32 to vector<8x32xf32>
    %7 = arith.maximumf %5, %6 : vector<8x32xf32>
    %c0_6 = arith.constant 0 : index
    %c0_7 = arith.constant 0 : index
    %8 = vector.load %arg4[%c0_6, %c0_7] : memref<32x8xf32, #tpu.memory_space<vmem>>, vector<32x8xf32>
    %cst_8 = arith.constant dense<0.000000e+00> : vector<8x8xf32>
    %9 = tpu.matmul %7, %8, %cst_8 {dimension_numbers = #tpu.dot_dimension_numbers<[1], [0], [0], [1], [0, 0, 1, 1], [], []>} : vector<8x32xf32>, vector<32x8xf32>, vector<8x8xf32> -> vector<8x8xf32>
    %c0_9 = arith.constant 0 : index
    %c0_10 = arith.constant 0 : index
    %10 = vector.load %arg5[%c0_9, %c0_10] : memref<1x8xf32, #tpu.memory_space<vmem>>, vector<1x8xf32>
    %11 = vector.broadcast %10 : vector<1x8xf32> to vector<8x8xf32>
    %12 = arith.addf %9, %11 : vector<8x8xf32>
    %cst_11 = arith.constant dense<0xFF800000> : vector<8xf32>
    %13 = vector.multi_reduction <maximumf>, %12, %cst_11 [1] : vector<8x8xf32> to vector<8xf32>
    %14 = vector.shape_cast %13 : vector<8xf32> to vector<8x1xf32>
    %15 = vector.broadcast %14 : vector<8x1xf32> to vector<8x8xf32>
    %16 = arith.subf %12, %15 : vector<8x8xf32>
    %17 = math.exp %16 : vector<8x8xf32>
    %cst_12 = arith.constant dense<0.000000e+00> : vector<8xf32>
    %18 = vector.multi_reduction <add>, %17, %cst_12 [1] : vector<8x8xf32> to vector<8xf32>
    %19 = vector.shape_cast %18 : vector<8xf32> to vector<8x1xf32>
    %20 = math.log %19 : vector<8x1xf32>
    %21 = vector.broadcast %20 : vector<8x1xf32> to vector<8x8xf32>
    %22 = arith.subf %16, %21 : vector<8x8xf32>
    %c0_13 = arith.constant 0 : index
    %c0_14 = arith.constant 0 : index
    %23 = vector.load %arg6[%c0_13, %c0_14] : memref<8x8xf32, #tpu.memory_space<vmem>>, vector<8x8xf32>
    tpu.vector_store %arg6[%c0_13, %c0_14], %22 {strides = array<i32>} : memref<8x8xf32, #tpu.memory_space<vmem>>, vector<8x8xf32>,
    return
  }
  func.func @transform_0(%arg0: i32) -> (i32, i32) {
    %c0_i32 = arith.constant 0 : i32
    %c0_i32_0 = arith.constant 0 : i32
    return %arg0, %c0_i32 : i32, i32
  }
  func.func @transform_1(%arg0: i32) -> (i32, i32) {
    %c0_i32 = arith.constant 0 : i32
    %c0_i32_0 = arith.constant 0 : i32
    %c0_i32_1 = arith.constant 0 : i32
    return %c0_i32, %c0_i32_0 : i32, i32
  }
  func.func @transform_2(%arg0: i32) -> (i32, i32) {
    %c0_i32 = arith.constant 0 : i32
    %c0_i32_0 = arith.constant 0 : i32
    %c0_i32_1 = arith.constant 0 : i32
    return %c0_i32, %c0_i32_0 : i32, i32
  }
  func.func @transform_3(%arg0: i32) -> (i32, i32) {
    %c0_i32 = arith.constant 0 : i32
    %c0_i32_0 = arith.constant 0 : i32
    %c0_i32_1 = arith.constant 0 : i32
    return %c0_i32, %c0_i32_0 : i32, i32
  }
  func.func @transform_4(%arg0: i32) -> (i32, i32) {
    %c0_i32 = arith.constant 0 : i32
    %c0_i32_0 = arith.constant 0 : i32
    %c0_i32_1 = arith.constant 0 : i32
    return %c0_i32, %c0_i32_0 : i32, i32
  }
  func.func @transform_5(%arg0: i32) -> (i32, i32) {
    %c0_i32 = arith.constant 0 : i32
    %c0_i32_0 = arith.constant 0 : i32
    return %arg0, %c0_i32 : i32, i32
  }
}

</mosaic_0001>

<bundles_post_ra>
// kernel: tpu_custom_call.1
= control target key start
LH: loop header
LB: loop body
LE: loop exit
PB: predicated region body
PF: predicated region fallthrough
CT: control target
= control target key end

     0   :  { %v290_v2 = vmov 0.0|0.0   ;;  %vm291_vm0 = vmmov 0   ;;  %v292_v4 = vmov 0.0   ;;  %s366_s0 = inlined_call_operand.vmem [shape: f32[8,16], index: 0, kind: input, shape index: {}]   ;;  %s367_s1 = inlined_call_operand.vmem [shape: f32[16,32], index: 1, kind: input, shape index: {}]   ;;  %s368_s2 = inlined_call_operand.vmem [shape: f32[1,32], index: 2, kind: input, shape index: {}]   ;;  %s369_s3 = inlined_call_operand.vmem [shape: f32[32,8], index: 3, kind: input, shape index: {}]   ;;  %s370_s4 = inlined_call_operand.vmem [shape: f32[1,8], index: 4, kind: input, shape index: {}]   ;;  %s371_s5 = inlined_call_operand.hbm [shape: f32[8,8], index: 5, kind: output, shape index: {}]  }
   0x1   :  { %v22_v0 = vld [vmem:[%s367_s1] sm:$0xff]  ;;  %v23_v1 = vld [vmem:[%s367_s1 + $0x8] sm:$0xff]  ;;  %249 = vmatprep.subr.bf16.mxu0 %v290_v2  ;;  %235 = vmatprep.mubr.msk.f32.mxu0 %vm291_vm0, %v292_v4 }
   0x2   :  { %v250_v3 = vpack.c.bf16 %v23_v1, %v22_v0  ;;  %v106_v5 = vld [vmem:[%s369_s3] sm:$0xff]  ;;  %v107_v6 = vld [vmem:[%s369_s3 + $0x8] sm:$0xff]  ;;  %252 = vmatprep.subr.bf16.mxu1 %v290_v2  ;;  %246 = vmatprep.mubr.msk.f32.mxu1 %vm291_vm0, %v292_v4 }
   0x3   :  { %v253_v7 = vpack.c.bf16 %v107_v6, %v106_v5 }
   0x4   :  { %10 = vsyncpa [#allocation3], 0  ;;  %251 = vmatpush3.bf16.msra.mxu0 %v250_v3  ;;  %v21_v8 = vld [vmem:[%s366_s0] sm:$0xff]  ;;  %vm31_vm1 = vcmask 130048   ;;  %v108_v9 = vld [vmem:[%s369_s3 + $0x10] sm:$0xff]  ;;  %vm117_vm2 = vcmask 261120  }
   0x5   :  { %254 = vmatpush3.bf16.msra.mxu1 %v253_v7  ;;  %v109_v10 = vld [vmem:[%s369_s3 + $0x18] sm:$0xff]  ;;  %v219_v12 = vld [vmem:[%s368_s2] ss:$0 sm:$0xff]  ;;  %vm191_vm3 = vcmask 64512   ;;  %s293_s2 = smov [#allocation2]  }
   0x6   :  { %255 = vmatprep.subr.bf16.mxu1 %v290_v2  ;;  %v256_v11 = vpack.c.bf16 %v109_v10, %v108_v9  ;;  %v221_v17 = vld [vmem:[%s370_s4] ss:$0 sm:$0xff]  ;;  %s211_s3 = sshll.u32 %s293_s2, 4  ;;  %s212_s3 = int_to_ptr.vmem [resolvable:$true] %s211_s3 }
   0x7   :  { %236 = vmatmul.mubr.msk.f32.vlgmr.msra.gmra.mrb[0].mxu0 %vm31_vm1, %v21_v8  ;;  %s266_s4 = scalar_lea.vmem %s212_s3, 128  ;;  %p271_p1 = scmp.lt.s32.totalorder %s212_s3, %s212_s3 }
   0x8   :  { %p267_p0 = scmp.ne.s32.totalorder %s212_s3, %s266_s4  ;;  %p272_p2 = scmp.lt.s32.totalorder %s266_s4, %s266_s4 }
   0x9   :  { %257 = vmatpush3.bf16.msra.mxu1 %v256_v11 }
   0xa   :  { %p273_p3 = por %p272_p2, %p271_p1 }
   0xc   :  { %p274_p4 = pnand %p273_p3, %p267_p0 }
  0xda   :  { %v101_v13 = vpop.f32.mrb[0].mxu0 }
  0xdb   :  { %v102_v14 = vadd.f32 %v219_v12, %v101_v13  ;;  %v237_v15 = vpop.f32.mrb[1].mxu0 }
  0xdd   :  { %v105_v16 = vmax.f32 %v102_v14, 0.0 }
  0xdf   :  { %247 = vmatmul.mubr.msk.f32.vlgmr.msra.gmra.mrb[0].mxu1 %vm117_vm2, %v105_v16 }
 0x1b2   :  { %v187_v18 = vpop.f32.mrb[0].mxu1 }
 0x1b3   :  { %v188_v19 = vadd.f32 %v221_v17, %v187_v18  ;;  %v248_v20 = vpop.f32.mrb[1].mxu1 }
 0x1b5   :  { %v192_v21 = vsel %vm191_vm3, %v188_v19, -inf }
 0x1b6   :  { %193 = vmax.xlane.f32.xlu0 %v192_v21 }
 0x243   :  { %v194_v22 = vpop.xlane.xlu0 %193 }
 0x244   :  { %v195_v23 = vsub.f32 %v188_v19, %v194_v22 }
 0x246   :  { %v196_v24 = vmul.f32 1.442695, %v195_v23 }
 0x248   :  { %262 = vpow2.f32 %v196_v24 }
 0x252   :  { %v263_v25 = vpop.eup %262 }
 0x253   :  { %v198_v26 = vsel %vm191_vm3, %v263_v25, 0.0 }
 0x254   :  { %199 = vadd.xlane.f32.xlu0 %v198_v26 }
 0x2e1   :  { %v200_v27 = vpop.xlane.xlu0 %199 }
 0x2e2   :  { %264 = vlog2.f32 %v200_v27 }
 0x2ec   :  { %v265_v28 = vpop.eup %264 }
 0x2ed   :  { %v202_v29 = vmul.f32 0.6931472, %v265_v28 }
 0x2ef   :  { %v203_v30 = vsub.f32 %v195_v23, %v202_v29 }
 0x2f1   :  { %204 = vst.msk [vmem:[#allocation2] sm:$0xff] %vm191_vm3, %v203_v30 }
 0x2f2   :  { %277 = shalt.err (!%p274_p4)
}
 0x2f3   :  { %s278_s11 = scalar_lea.hbm %s371_s5, 128 }
 0x2f4   :  { %p279_p5 = scmp.ne.s32.totalorder %s371_s5, %s278_s11  ;;  %p282_p6 = scmp.lt.u32.totalorder %s278_s11, %s371_s5 }
 0x2f6   :  { %p284_p7 = pnand %p282_p6, %p279_p5 }
 0x2f8   :  { %287 = shalt.err (!%p284_p7)
}
 0x2f9   :  { %214 = dma.vmem_to_hbm [thread:$0]  %s212_s3, 128, %s371_s5, [#allocation3]  }
 0x2fa   :  { %288 = dma.done.wait [#allocation3], 128  }
 0x2fb   :  { %289 = vsyncadd [#allocation3], 4294967168 }
 0x2fc   :  { %218 = vsyncpa [#allocation3], 1 }

</bundles_post_ra>
